<compile_context>
chip_gen: v7x
topology: tpu7x:2x2x1
jax: 0.10.0
libtpu: 0.0.40
codegen_flags: <defaults>
</compile_context>

<pallas_src>
import functools

import jax
import jax.numpy as jnp
from jax import lax
from jax.experimental import pallas as pl
from jax.experimental.pallas import tpu as pltpu

LANE = 128
_EPS = 1e-12
_NEG_BIG = -1e30
_KPAD = 128          # lane-dense width of the top-k index output
_LEAK = 0.01         # LeakyReLU negative slope


def _round_up(n, m):
    return ((n + m - 1) // m) * m


def _pad2d(x, rows, cols):
    return jnp.pad(x, ((0, rows - x.shape[0]), (0, cols - x.shape[1])))


def _row_spec(tile, cols):
    return pl.BlockSpec((tile, cols), lambda i: (i, 0))


def _full_spec(rows, cols):
    return pl.BlockSpec((rows, cols), lambda i: (0, 0))


def _compiler_params():
    # Row axis is embarrassingly parallel -> shard it across the 2 TCs on v7x.
    # vmem_limit raised above the 16 MiB v5e scoped default; at a 256-row tile
    # the double-buffered [tile, N] bf16 adjacency slab plus the full Z /
    # weight blocks stay well under 32 MiB for N up to ~8K on every generation.
    return pltpu.CompilerParams(
        dimension_semantics=("parallel",),
        vmem_limit_bytes=32 * 1024 * 1024,
    )


def _pick_row_tiling(n):
    # >=16 rows (bf16 sublane packing); cap at 256-row tiles for large N so
    # the per-step working set stays within the VMEM budget on v7x (64 MiB).
    if n <= 256:
        n_pad = _round_up(max(n, 16), 16)
        return n_pad, n_pad
    tile = 256
    return _round_up(n, tile), tile


# ----------------------------------------------------------------------------
# Kernel 1: fused per-view projection (ReLU) + cosine normalization + X @ W1.
# ----------------------------------------------------------------------------

def _project_kernel(x_ref, wf_ref, bf_ref, w1_ref, xn_ref, z1_ref):
    # One block-structured matmul replaces the three per-view projections.
    y = jnp.dot(x_ref[...], wf_ref[...], preferred_element_type=jnp.float32)
    h = jnp.maximum(y + bf_ref[...], 0.0)                              # ReLU (f32)
    hn = h * lax.rsqrt(jnp.sum(h * h, axis=1, keepdims=True) + _EPS)   # cosine norm
    xn_ref[...] = hn.astype(jnp.bfloat16)
    z1_ref[...] = jnp.dot(h.astype(jnp.bfloat16), w1_ref[...],
                          preferred_element_type=jnp.float32).astype(jnp.bfloat16)


def project_views(x_cat, w_fused, b_fused, w1, tile):
    n_pad, d_pad = x_cat.shape
    hcat = w_fused.shape[1]
    hp = w1.shape[1]
    return pl.pallas_call(
        _project_kernel,
        grid=(n_pad // tile,),
        in_specs=[_row_spec(tile, d_pad),
                  _full_spec(d_pad, hcat),
                  _full_spec(1, hcat),
                  _full_spec(hcat, hp)],
        out_specs=(_row_spec(tile, hcat), _row_spec(tile, hp)),
        out_shape=(jax.ShapeDtypeStruct((n_pad, hcat), jnp.bfloat16),
                   jax.ShapeDtypeStruct((n_pad, hp), jnp.bfloat16)),
        compiler_params=_compiler_params(),
    )(x_cat, w_fused, b_fused, w1)


# ----------------------------------------------------------------------------
# Kernel 2: cosine similarity (row tile vs all rows) + in-kernel top-k indices.
# The dense [N, N] similarity never leaves VMEM; only [N, k] indices do.
# ----------------------------------------------------------------------------

def _topk_kernel(xn_ref, xn_all_ref, idx_ref, *, k, n_valid):
    # NT matmul: contract the last axes of both operands (no XLU transpose).
    sim = lax.dot_general(xn_ref[...], xn_all_ref[...],
                          dimension_numbers=(((1,), (1,)), ((), ())),
                          preferred_element_type=jnp.float32)
    t, n_pad = sim.shape
    colf = lax.broadcasted_iota(jnp.int32, (t, n_pad), 1).astype(jnp.float32)
    cur = jnp.where(colf < float(n_valid), sim, _NEG_BIG)   # mask padded columns
    lane = lax.broadcasted_iota(jnp.int32, idx_ref.shape, 1)
    out = jnp.zeros(idx_ref.shape, jnp.int32)
    for j in range(k):                                      # k is tiny; static unroll
        m = jnp.max(cur, axis=1, keepdims=True)
        idx_f = jnp.min(jnp.where(cur == m, colf, float(n_pad)),
                        axis=1, keepdims=True)              # smallest index on ties
        out = jnp.where(lane == j, idx_f.astype(jnp.int32), out)
        cur = jnp.where(colf == idx_f, _NEG_BIG, cur)
    idx_ref[...] = out


def topk_neighbors(xn, k, n_valid, tile):
    assert k <= _KPAD
    n_pad, hcat = xn.shape
    return pl.pallas_call(
        functools.partial(_topk_kernel, k=k, n_valid=n_valid),
        grid=(n_pad // tile,),
        in_specs=[_row_spec(tile, hcat), _full_spec(n_pad, hcat)],
        out_specs=_row_spec(tile, _KPAD),
        out_shape=jax.ShapeDtypeStruct((n_pad, _KPAD), jnp.int32),
        compiler_params=_compiler_params(),
    )(xn, xn)


# ----------------------------------------------------------------------------
# Kernel 3: GCN layer (A_tile @ Z, LeakyReLU, L2 row norm) + next-layer W.
# Kernel 4: same aggregate + classifier linear + softmax.
# ----------------------------------------------------------------------------

def _gcn_hidden_kernel(a_ref, z_ref, w_next_ref, out_ref):
    h = jnp.dot(a_ref[...], z_ref[...], preferred_element_type=jnp.float32)
    h = jnp.where(h > 0, h, _LEAK * h)                                  # LeakyReLU
    h = h * lax.rsqrt(jnp.sum(h * h, axis=1, keepdims=True) + _EPS)     # L2 norm
    out_ref[...] = jnp.dot(h.astype(jnp.bfloat16), w_next_ref[...],
                           preferred_element_type=jnp.float32).astype(jnp.bfloat16)


def gcn_hidden(a, z, w_next, tile):
    n_pad = a.shape[0]
    f_in, f_out = w_next.shape[0], w_next.shape[1]
    return pl.pallas_call(
        _gcn_hidden_kernel,
        grid=(n_pad // tile,),
        in_specs=[_row_spec(tile, n_pad),
                  _full_spec(n_pad, f_in),
                  _full_spec(f_in, f_out)],
        out_specs=_row_spec(tile, f_out),
        out_shape=jax.ShapeDtypeStruct((n_pad, f_out), jnp.bfloat16),
        compiler_params=_compiler_params(),
    )(a, z, w_next)


def _gcn_classifier_kernel(a_ref, z_ref, wc_ref, bc_ref, out_ref, *, num_class):
    h = jnp.dot(a_ref[...], z_ref[...], preferred_element_type=jnp.float32)
    h = jnp.where(h > 0, h, _LEAK * h)
    h = h * lax.rsqrt(jnp.sum(h * h, axis=1, keepdims=True) + _EPS)
    logits = jnp.dot(h.astype(jnp.bfloat16), wc_ref[...],
                     preferred_element_type=jnp.float32) + bc_ref[...]
    col = lax.broadcasted_iota(jnp.int32, logits.shape, 1)
    logits = jnp.where(col < num_class, logits, _NEG_BIG)   # mask padded classes
    m = jnp.max(logits, axis=1, keepdims=True)
    e = jnp.exp(logits - m)
    out_ref[...] = e / jnp.sum(e, axis=1, keepdims=True)    # exact reciprocal


def gcn_classify(a, z, wc, bc, num_class, tile):
    n_pad = a.shape[0]
    f_in, cp = wc.shape[0], wc.shape[1]
    return pl.pallas_call(
        functools.partial(_gcn_classifier_kernel, num_class=num_class),
        grid=(n_pad // tile,),
        in_specs=[_row_spec(tile, n_pad),
                  _full_spec(n_pad, f_in),
                  _full_spec(f_in, cp),
                  _full_spec(1, cp)],
        out_specs=_row_spec(tile, cp),
        out_shape=jax.ShapeDtypeStruct((n_pad, cp), jnp.float32),
        compiler_params=_compiler_params(),
    )(a, z, wc, bc)


# ----------------------------------------------------------------------------
# JAX glue: dense kNN adjacency (scatter) + symmetric normalization.
# ----------------------------------------------------------------------------

def build_knn_adjacency(idx, n):
    # TODO(synk): dense N^2 scatter/normalize glue; a fully sparse (gathered)
    # GCN via PrefetchScalarGridSpec would avoid materializing the adjacency.
    adj = jnp.zeros((n, n), jnp.float32)
    adj = adj.at[jnp.arange(n)[:, None], idx].set(1.0)
    adj = jnp.maximum(adj, adj.T)                            # symmetrize
    adj = jnp.maximum(adj, jnp.eye(n, dtype=jnp.float32))    # self loops
    # TODO(synk): self-loops added after symmetrization, before degree norm;
    # verify ordering against the reference AglMGae A_hat = D^-1/2 (A+I) D^-1/2.
    deg = jnp.sum(adj, axis=1)
    d_inv_sqrt = lax.rsqrt(deg)
    return adj * d_inv_sqrt[:, None] * d_inv_sqrt[None, :]


# ----------------------------------------------------------------------------
# Parameter init (logical shapes) + one-time pad/bf16-cast of parameters.
# ----------------------------------------------------------------------------

def _glorot(key, shape):
    fan_in, fan_out = shape
    lim = (6.0 / (fan_in + fan_out)) ** 0.5
    return jax.random.uniform(key, shape, jnp.float32, -lim, lim)


def init_params(key, in_dims, hid_dim, num_class, num_views):
    num_enc_layers = 2
    keys = jax.random.split(key, num_views + num_enc_layers + 1)
    params = {}
    params["project"] = [
        (_glorot(keys[i], (in_dims[i], hid_dim)), jnp.zeros((1, hid_dim), jnp.float32))
        for i in range(num_views)
    ]
    enc_dims = [hid_dim * num_views, hid_dim, hid_dim]
    params["encoder"] = [
        _glorot(keys[num_views + l], (enc_dims[l], enc_dims[l + 1]))
        for l in range(num_enc_layers)
    ]
    params["pre_w"] = _glorot(keys[-1], (hid_dim, num_class))
    params["pre_b"] = jnp.zeros((1, num_class), jnp.float32)
    return params


def pad_and_cast_params(params, in_dims, hid_dim, num_class, num_views):
    """Done ONCE outside the per-call forward (perf feedback)."""
    hp = _round_up(hid_dim, LANE)
    cp = _round_up(num_class, LANE)
    d_total = sum(in_dims)
    d_pad = _round_up(d_total, LANE)
    hcat = num_views * hp

    # Fused projection weight: block-structured [raw concat dim -> V * hp].
    w_fused = jnp.zeros((d_pad, hcat), jnp.float32)
    b_fused = jnp.zeros((1, hcat), jnp.float32)
    row_off = 0
    for v, (w, b) in enumerate(params["project"]):
        w_fused = w_fused.at[row_off:row_off + in_dims[v],
                             v * hp:v * hp + hid_dim].set(w)
        b_fused = b_fused.at[:, v * hp:v * hp + hid_dim].set(b)
        row_off += in_dims[v]

    # Encoder W1: re-place each per-view row block at its padded offset so it
    # lines up with the padded concat layout [V * hp].
    w1 = params["encoder"][0]
    w1_pad = jnp.zeros((hcat, hp), jnp.float32)
    for v in range(num_views):
        w1_pad = w1_pad.at[v * hp:v * hp + hid_dim, :hid_dim].set(
            w1[v * hid_dim:(v + 1) * hid_dim, :])
    w2_pad = _pad2d(params["encoder"][1], hp, hp)
    wc_pad = _pad2d(params["pre_w"], hp, cp)
    bc_pad = _pad2d(params["pre_b"], 1, cp)

    return {
        "in_dims": tuple(in_dims),
        "hid_dim": hid_dim,
        "num_class": num_class,
        "num_views": num_views,
        "w_fused": w_fused.astype(jnp.bfloat16),
        "b_fused": b_fused,                      # bias / elementwise stay f32
        "w1": w1_pad.astype(jnp.bfloat16),
        "w2": w2_pad.astype(jnp.bfloat16),
        "wc": wc_pad.astype(jnp.bfloat16),
        "bc": bc_pad,
    }


# ----------------------------------------------------------------------------
# Forward pass (inference semantics of the PyTorch module).
# ----------------------------------------------------------------------------

def view_fusion_forward(padded, view_feat, k, training=False):
    num_views = padded["num_views"]
    num_class = padded["num_class"]

    n = view_feat[0].shape[0]
    n_pad, tile = _pick_row_tiling(n)
    d_pad = padded["w_fused"].shape[0]

    # Raw views concatenated along features; padded rows/cols are zeros.
    x_cat = jnp.concatenate([view_feat[v].astype(jnp.float32)
                             for v in range(num_views)], axis=1)
    x_cat = _pad2d(x_cat, n_pad, d_pad).astype(jnp.bfloat16)

    # Kernel 1: fused projections + cosine normalization + X @ W1.
    xn, z1 = project_views(x_cat, padded["w_fused"], padded["b_fused"],
                           padded["w1"], tile)

    # Kernel 2: similarity + in-kernel top-k (no dense sim written to HBM).
    idx_pad = topk_neighbors(xn, k, n, tile)
    idx = idx_pad[:n, :k]

    # Glue: dense symmetric normalized adjacency, bf16-cast (largest operand
    # of the HBM-bound A @ (XW) matmuls). Zero pad rows/cols keep padding inert.
    a_norm = build_knn_adjacency(idx, n)
    a_pad = _pad2d(a_norm, n_pad, n_pad).astype(jnp.bfloat16)

    # Kernel 3: GCN layer 1 aggregate (+LeakyReLU, L2 norm) fused with W2.
    z2 = gcn_hidden(a_pad, z1, padded["w2"], tile)

    # Kernel 4: GCN layer 2 aggregate fused with classifier + softmax.
    pre_pad = gcn_classify(a_pad, z2, padded["wc"], padded["bc"], num_class, tile)
    pre = pre_pad[:n, :num_class]

    loss = 0.0  # TODO(synk): training-only losses (sce / CE / recon) not reproduced.
    return pre, loss


# ----------------------------------------------------------------------------
# Demo
# ----------------------------------------------------------------------------

if __name__ == "__main__":
    N = 8                       # number of samples / graph nodes
    in_dims = [16, 24, 32]      # per-view input feature dims
    hid_dim = 32
    num_class = 4
    num_views = 3
    k = 3

    key = jax.random.PRNGKey(0)
    k_param, k0, k1, k2 = jax.random.split(key, 4)
    view_feat = [
        jax.random.normal(k0, (N, in_dims[0]), jnp.float32),
        jax.random.normal(k1, (N, in_dims[1]), jnp.float32),
        jax.random.normal(k2, (N, in_dims[2]), jnp.float32),
    ]

    params = init_params(k_param, in_dims, hid_dim, num_class, num_views)
    padded = pad_and_cast_params(params, in_dims, hid_dim, num_class, num_views)

    pre, loss = view_fusion_forward(padded, view_feat, k, training=False)
    pre = jax.block_until_ready(pre)

    assert pre.shape == (N, num_class)
    assert bool(jnp.all(jnp.isfinite(pre)))
    assert bool(jnp.allclose(jnp.sum(pre, axis=1), 1.0, atol=1e-3))
    print("KERNEL_OK")
</pallas_src>

<mosaic_0001>
module attributes {stable_mosaic.version = 11 : i64} {
  func.func @_project_kernel(%arg0: i32, %arg1: memref<16x128xbf16, #tpu.memory_space<vmem>>, %arg2: memref<128x384xbf16, #tpu.memory_space<vmem>>, %arg3: memref<1x384xf32, #tpu.memory_space<vmem>>, %arg4: memref<384x128xbf16, #tpu.memory_space<vmem>>, %arg5: memref<16x384xbf16, #tpu.memory_space<vmem>>, %arg6: memref<16x128xbf16, #tpu.memory_space<vmem>>) attributes {dimension_semantics = [#tpu.dimension_semantics<parallel>], iteration_bounds = array<i64: 1>, scalar_prefetch = 0 : i64, scratch_operands = 0 : i64, tpu.core_type = #tpu.core_type<tc>, window_params = [{transform_indices = @transform_0, window_bounds = array<i64: 16, 128>}, {pipeline_mode = #tpu.pipeline_mode<synchronous>, transform_indices = @transform_1, window_bounds = array<i64: 128, 384>}, {pipeline_mode = #tpu.pipeline_mode<synchronous>, transform_indices = @transform_2, window_bounds = array<i64: 1, 384>}, {pipeline_mode = #tpu.pipeline_mode<synchronous>, transform_indices = @transform_3, window_bounds = array<i64: 384, 128>}, {transform_indices = @transform_4, window_bounds = array<i64: 16, 384>}, {transform_indices = @transform_5, window_bounds = array<i64: 16, 128>}]} {
    %c0 = arith.constant 0 : index
    %c0_0 = arith.constant 0 : index
    %0 = vector.load %arg1[%c0, %c0_0] : memref<16x128xbf16, #tpu.memory_space<vmem>>, vector<16x128xbf16>
    %c0_1 = arith.constant 0 : index
    %c0_2 = arith.constant 0 : index
    %1 = vector.load %arg2[%c0_1, %c0_2] : memref<128x384xbf16, #tpu.memory_space<vmem>>, vector<128x384xbf16>
    %cst = arith.constant dense<0.000000e+00> : vector<16x384xf32>
    %2 = tpu.matmul %0, %1, %cst {dimension_numbers = #tpu.dot_dimension_numbers<[1], [0], [0], [1], [0, 0, 1, 1], [], []>} : vector<16x128xbf16>, vector<128x384xbf16>, vector<16x384xf32> -> vector<16x384xf32>
    %c0_3 = arith.constant 0 : index
    %c0_4 = arith.constant 0 : index
    %3 = vector.load %arg3[%c0_3, %c0_4] : memref<1x384xf32, #tpu.memory_space<vmem>>, vector<1x384xf32>
    %4 = vector.broadcast %3 : vector<1x384xf32> to vector<16x384xf32>
    %5 = arith.addf %2, %4 : vector<16x384xf32>
    %cst_5 = arith.constant 0.000000e+00 : f32
    %6 = vector.broadcast %cst_5 : f32 to vector<16x384xf32>
    %7 = arith.maximumf %5, %6 : vector<16x384xf32>
    %8 = arith.mulf %7, %7 : vector<16x384xf32>
    %cst_6 = arith.constant dense<0.000000e+00> : vector<16xf32>
    %9 = vector.multi_reduction <add>, %8, %cst_6 [1] : vector<16x384xf32> to vector<16xf32>
    %10 = vector.shape_cast %9 : vector<16xf32> to vector<16x1xf32>
    %cst_7 = arith.constant 9.99999996E-13 : f32
    %11 = vector.broadcast %cst_7 : f32 to vector<16x1xf32>
    %12 = arith.addf %10, %11 : vector<16x1xf32>
    %13 = math.rsqrt %12 : vector<16x1xf32>
    %14 = vector.broadcast %13 : vector<16x1xf32> to vector<16x384xf32>
    %15 = arith.mulf %7, %14 : vector<16x384xf32>
    %16 = arith.truncf %15 : vector<16x384xf32> to vector<16x384xbf16>
    %c0_8 = arith.constant 0 : index
    %c0_9 = arith.constant 0 : index
    %17 = vector.load %arg5[%c0_8, %c0_9] : memref<16x384xbf16, #tpu.memory_space<vmem>>, vector<16x384xbf16>
    tpu.vector_store %arg5[%c0_8, %c0_9], %16 {strides = array<i32>} : memref<16x384xbf16, #tpu.memory_space<vmem>>, vector<16x384xbf16>,
    %18 = arith.truncf %7 : vector<16x384xf32> to vector<16x384xbf16>
    %c0_10 = arith.constant 0 : index
    %c0_11 = arith.constant 0 : index
    %19 = vector.load %arg4[%c0_10, %c0_11] : memref<384x128xbf16, #tpu.memory_space<vmem>>, vector<384x128xbf16>
    %cst_12 = arith.constant dense<0.000000e+00> : vector<16x128xf32>
    %20 = tpu.matmul %18, %19, %cst_12 {dimension_numbers = #tpu.dot_dimension_numbers<[1], [0], [0], [1], [0, 0, 1, 1], [], []>} : vector<16x384xbf16>, vector<384x128xbf16>, vector<16x128xf32> -> vector<16x128xf32>
    %21 = arith.truncf %20 : vector<16x128xf32> to vector<16x128xbf16>
    %c0_13 = arith.constant 0 : index
    %c0_14 = arith.constant 0 : index
    %22 = vector.load %arg6[%c0_13, %c0_14] : memref<16x128xbf16, #tpu.memory_space<vmem>>, vector<16x128xbf16>
    tpu.vector_store %arg6[%c0_13, %c0_14], %21 {strides = array<i32>} : memref<16x128xbf16, #tpu.memory_space<vmem>>, vector<16x128xbf16>,
    return
  }
  func.func @transform_0(%arg0: i32) -> (i32, i32) {
    %c0_i32 = arith.constant 0 : i32
    %c0_i32_0 = arith.constant 0 : i32
    return %arg0, %c0_i32 : i32, i32
  }
  func.func @transform_1(%arg0: i32) -> (i32, i32) {
    %c0_i32 = arith.constant 0 : i32
    %c0_i32_0 = arith.constant 0 : i32
    %c0_i32_1 = arith.constant 0 : i32
    return %c0_i32, %c0_i32_0 : i32, i32
  }
  func.func @transform_2(%arg0: i32) -> (i32, i32) {
    %c0_i32 = arith.constant 0 : i32
    %c0_i32_0 = arith.constant 0 : i32
    %c0_i32_1 = arith.constant 0 : i32
    return %c0_i32, %c0_i32_0 : i32, i32
  }
  func.func @transform_3(%arg0: i32) -> (i32, i32) {
    %c0_i32 = arith.constant 0 : i32
    %c0_i32_0 = arith.constant 0 : i32
    %c0_i32_1 = arith.constant 0 : i32
    return %c0_i32, %c0_i32_0 : i32, i32
  }
  func.func @transform_4(%arg0: i32) -> (i32, i32) {
    %c0_i32 = arith.constant 0 : i32
    %c0_i32_0 = arith.constant 0 : i32
    return %arg0, %c0_i32 : i32, i32
  }
  func.func @transform_5(%arg0: i32) -> (i32, i32) {
    %c0_i32 = arith.constant 0 : i32
    %c0_i32_0 = arith.constant 0 : i32
    return %arg0, %c0_i32 : i32, i32
  }
}

</mosaic_0001>

<bundles_post_ra>
// kernel: tpu_custom_call.1
= control target key start
LH: loop header
LB: loop body
LE: loop exit
PB: predicated region body
PF: predicated region fallthrough
CT: control target
= control target key end

     0   :  { %11 = vsyncpa [#allocation3], 0  ;;  %s1184_s0 = inlined_call_operand.hbm [shape: bf16[16,128], index: 0, kind: input, shape index: {}]   ;;  %s1185_s1 = inlined_call_operand.hbm [shape: bf16[128,384], index: 1, kind: input, shape index: {}]   ;;  %s1186_s2 = inlined_call_operand.vmem [shape: f32[1,384], index: 2, kind: input, shape index: {}]   ;;  %s1187_s3 = inlined_call_operand.hbm [shape: bf16[384,128], index: 3, kind: input, shape index: {}]   ;;  %s1188_s4 = inlined_call_operand.hbm [shape: bf16[16,384], index: 4, kind: output, shape index: {0}]   ;;  %s1189_s5 = inlined_call_operand.hbm [shape: bf16[16,128], index: 5, kind: output, shape index: {1}]  }
   0x1   :  { %12 = vsyncpa [#allocation6], 0 }
   0x2   :  { %13 = vsyncpa [#allocation4], 0 }
   0x3   :  { %14 = vsyncpa [#allocation10], 0  ;;  %s1044_s18 = smov [#allocation5]   ;;  %s926_s22 = scalar_lea.hbm %s1185_s1, 3072 }
   0x4   :  { %s32_s19 = sshll.u32 %s1044_s18, 4  ;;  %p927_p0 = scmp.ne.s32.totalorder %s1185_s1, %s926_s22  ;;  %s33_s19 = int_to_ptr.vmem [resolvable:$true] %s32_s19 }
   0x5   :  { %p930_p1 = scmp.lt.u32.totalorder %s926_s22, %s1185_s1 }
   0x7   :  { %p932_p2 = pnand %p930_p1, %p927_p0 }
   0x9   :  { %935 = shalt.err (!%p932_p2)
}
   0xa   :  { %s936_s27 = scalar_lea.vmem %s33_s19, 3072  ;;  %p941_p4 = scmp.lt.s32.totalorder %s33_s19, %s33_s19 }
   0xb   :  { %p937_p3 = scmp.ne.s32.totalorder %s33_s19, %s936_s27  ;;  %p942_p5 = scmp.lt.s32.totalorder %s936_s27, %s936_s27 }
   0xd   :  { %p943_p6 = por %p942_p5, %p941_p4 }
   0xf   :  { %p944_p7 = pnand %p943_p6, %p937_p3 }
  0x11   :  { %947 = shalt.err (!%p944_p7)
}
  0x12   :  { %s1045_s28 = smov 192   ;;  %s1046_s29 = smov 12  }
  0x13   :  { %38 = dma.hbm_to_vmem [thread:$0]  %s1185_s1, 3072, %s33_s19, [#allocation6], %s1045_s28, %s1045_s28, %s1046_s29  }
  0x14   :  { %s1047_s7 = smov [#allocation2]   ;;  %s948_s11 = scalar_lea.hbm %s1184_s0, 128 }
  0x15   :  { %s20_s8 = sshll.u32 %s1047_s7, 4  ;;  %p949_p8 = scmp.ne.s32.totalorder %s1184_s0, %s948_s11  ;;  %s21_s8 = int_to_ptr.vmem [resolvable:$true] %s20_s8 }
  0x16   :  { %p952_p9 = scmp.lt.u32.totalorder %s948_s11, %s1184_s0 }
  0x18   :  { %p954_p10 = pnand %p952_p9, %p949_p8 }
  0x1a   :  { %957 = shalt.err (!%p954_p10)
}
  0x1b   :  { %s958_s16 = scalar_lea.vmem %s21_s8, 128  ;;  %p963_p12 = scmp.lt.s32.totalorder %s21_s8, %s21_s8 }
  0x1c   :  { %p959_p11 = scmp.ne.s32.totalorder %s21_s8, %s958_s16  ;;  %p964_p13 = scmp.lt.s32.totalorder %s958_s16, %s958_s16 }
  0x1e   :  { %p965_p0 = por %p964_p13, %p963_p12 }
  0x20   :  { %p966_p1 = pnand %p965_p0, %p959_p11 }
  0x22   :  { %969 = shalt.err (!%p966_p1)
}
  0x23   :  { %s1048_s1 = smov 64   ;;  %s1049_s17 = smov 4  }
  0x24   :  { %26 = dma.hbm_to_vmem [thread:$0]  %s1184_s0, 128, %s21_s8, [#allocation3], %s1048_s1, %s1048_s1, %s1049_s17  }
  0x25   :  { %s1050_s20 = smov [#allocation7]   ;;  %s970_s24 = scalar_lea.hbm %s1187_s3, 3072 }
  0x26   :  { %s46_s21 = sshll.u32 %s1050_s20, 4  ;;  %p971_p2 = scmp.ne.s32.totalorder %s1187_s3, %s970_s24  ;;  %s47_s21 = int_to_ptr.vmem [resolvable:$true] %s46_s21 }
  0x27   :  { %p974_p3 = scmp.lt.u32.totalorder %s970_s24, %s1187_s3 }
  0x29   :  { %p976_p4 = pnand %p974_p3, %p971_p2 }
  0x2b   :  { %979 = shalt.err (!%p976_p4)
}
  0x2c   :  { %s980_s6 = scalar_lea.vmem %s47_s21, 3072  ;;  %p985_p6 = scmp.lt.s32.totalorder %s47_s21, %s47_s21 }
  0x2d   :  { %p981_p5 = scmp.ne.s32.totalorder %s47_s21, %s980_s6  ;;  %p986_p7 = scmp.lt.s32.totalorder %s980_s6, %s980_s6 }
  0x2f   :  { %p987_p8 = por %p986_p7, %p985_p6 }
  0x31   :  { %p988_p9 = pnand %p987_p8, %p981_p5 }
  0x33   :  { %991 = shalt.err (!%p988_p9)
}
  0x34   :  { %52 = dma.hbm_to_vmem [thread:$0]  %s1187_s3, 3072, %s47_s21, [#allocation6], %s1048_s1, %s1048_s1, %s1049_s17  }
  0x35   :  { %1036 = dma.done.wait [#allocation3], 128  }
  0x36   :  { %1037 = vsyncadd [#allocation3], 4294967168 }
  0x37   :  { %1038 = dma.done.wait [#allocation6], 6144  }
  0x38   :  { %1039 = vsyncadd [#allocation6], 4294961152  ;;  %v1051_v0 = vmov 0.0   ;;  %v1052_v1 = vmov 0   ;;  %vm1053_vm0 = vmmov 0   ;;  %v899_v26 = vld [vmem:[#allocation7 + $0x40] sm:$0xff]   ;;  %v99_v51 = vlaneseq }
  0x39   :  { %813 = vmatprep.subr.bf16.mxu1 %v1051_v0  ;;  %280 = vmatprep.mubr.bf16.mxu0 %v1052_v1  ;;  %v865_v2 = vld [vmem:[#allocation5 + $0x4] ss:$12 sps:$4 sm:$0xff]   ;;  %v867_v3 = vld [vmem:[#allocation5] ss:$12 sps:$4 sm:$0xff]   ;;  %v868_v4 = vld [vmem:[#allocation5 + $0x8] ss:$12 sps:$4 sm:$0xff]  }
  0x3a   :  { %829 = vmatprep.mubr.msk.bf16.mxu1 %vm1053_vm0, %v1051_v0  ;;  %248 = vmatprep.subr.bf16.mxu0 %v865_v2  ;;  %v869_v5 = vld [vmem:[#allocation5 + $0x1c] ss:$12 sps:$4 sm:$0xff]   ;;  %v871_v6 = vld [vmem:[#allocation5 + $0x18] ss:$12 sps:$4 sm:$0xff]   ;;  %v872_v7 = vld [vmem:[#allocation5 + $0x20] ss:$12 sps:$4 sm:$0xff]  }
  0x3b   :  { %249 = vmatpush1.bf16.msra.mxu0 %v867_v3  ;;  %814 = vmatpush3.bf16.msra.mxu1 %v868_v4  ;;  %v873_v8 = vld [vmem:[#allocation5 + $0x34] ss:$12 sps:$4 sm:$0xff]   ;;  %v875_v9 = vld [vmem:[#allocation5 + $0x30] ss:$12 sps:$4 sm:$0xff]   ;;  %v876_v10 = vld [vmem:[#allocation5 + $0x38] ss:$12 sps:$4 sm:$0xff]  }
  0x3c   :  { %250 = vmatprep.subr.bf16.mxu0 %v869_v5  ;;  %815 = vmatprep.subr.bf16.mxu1 %v1051_v0  ;;  %v877_v11 = vld [vmem:[#allocation5 + $0x4c] ss:$12 sps:$4 sm:$0xff]   ;;  %v879_v12 = vld [vmem:[#allocation5 + $0x48] ss:$12 sps:$4 sm:$0xff]   ;;  %v880_v13 = vld [vmem:[#allocation5 + $0x50] ss:$12 sps:$4 sm:$0xff]  }
  0x3d   :  { %v881_v14 = vld [vmem:[#allocation5 + $0x64] ss:$12 sps:$4 sm:$0xff]   ;;  %v883_v15 = vld [vmem:[#allocation5 + $0x60] ss:$12 sps:$4 sm:$0xff]   ;;  %v884_v16 = vld [vmem:[#allocation5 + $0x68] ss:$12 sps:$4 sm:$0xff]  }
  0x3e   :  { %v885_v17 = vld [vmem:[#allocation5 + $0x7c] ss:$12 sps:$4 sm:$0xff]   ;;  %v887_v18 = vld [vmem:[#allocation5 + $0x78] ss:$12 sps:$4 sm:$0xff]   ;;  %v888_v19 = vld [vmem:[#allocation5 + $0x80] ss:$12 sps:$4 sm:$0xff]  }
  0x3f   :  { %251 = vmatpush1.bf16.msra.mxu0 %v871_v6  ;;  %816 = vmatpush3.bf16.msra.mxu1 %v872_v7  ;;  %v889_v20 = vld [vmem:[#allocation5 + $0x94] ss:$12 sps:$4 sm:$0xff]   ;;  %v891_v21 = vld [vmem:[#allocation5 + $0x90] ss:$12 sps:$4 sm:$0xff]   ;;  %v892_v22 = vld [vmem:[#allocation5 + $0x98] ss:$12 sps:$4 sm:$0xff]  }
  0x40   :  { %252 = vmatprep.subr.bf16.mxu0 %v873_v8  ;;  %817 = vmatprep.subr.bf16.mxu1 %v1051_v0  ;;  %v893_v23 = vld [vmem:[#allocation5 + $0xac] ss:$12 sps:$4 sm:$0xff]   ;;  %v895_v24 = vld [vmem:[#allocation5 + $0xa8] ss:$12 sps:$4 sm:$0xff]   ;;  %v896_v25 = vld [vmem:[#allocation5 + $0xb0] ss:$12 sps:$4 sm:$0xff]  }
  0x41   :  { %v897_v27 = vld [vmem:[#allocation2] sm:$0xff]   ;;  %v898_v28 = vld [vmem:[#allocation7 + $0x80] sm:$0xff]   ;;  %v902_v30 = vld [vmem:[#allocation7 + $0x48] sm:$0xff]   ;;  %v100_v52 = vshrl.u32 %v99_v51, 7 }
  0x42   :  { %v900_v29 = vld [vmem:[#allocation7] sm:$0xff]   ;;  %v903_v31 = vld [vmem:[#allocation7 + $0x8] sm:$0xff]   ;;  %v905_v33 = vld [vmem:[#allocation7 + $0x50] sm:$0xff]  }
  0x43   :  { %253 = vmatpush1.bf16.msra.mxu0 %v875_v9  ;;  %818 = vmatpush3.bf16.msra.mxu1 %v876_v10  ;;  %v901_v32 = vld [vmem:[#allocation7 + $0x88] sm:$0xff]   ;;  %v906_v34 = vld [vmem:[#allocation7 + $0x10] sm:$0xff]   ;;  %v908_v36 = vld [vmem:[#allocation7 + $0x58] sm:$0xff]   ;;  %v101_v53 = vsub.s32 0, %v100_v52  ;;  %v109_v55 = vsub.s32 2, %v100_v52  ;;  %v105_v56 = vsub.s32 1, %v100_v52 }
  0x44   :  { %254 = vmatprep.subr.bf16.mxu0 %v877_v11  ;;  %819 = vmatprep.subr.bf16.mxu1 %v1051_v0  ;;  %v904_v35 = vld [vmem:[#allocation7 + $0x90] sm:$0xff]   ;;  %v909_v37 = vld [vmem:[#allocation7 + $0x18] sm:$0xff]   ;;  %v911_v39 = vld [vmem:[#allocation7 + $0x60] sm:$0xff]  }
  0x45   :  { %v907_v38 = vld [vmem:[#allocation7 + $0x98] sm:$0xff]   ;;  %v912_v40 = vld [vmem:[#allocation7 + $0x20] sm:$0xff]   ;;  %v914_v42 = vld [vmem:[#allocation7 + $0x68] sm:$0xff]  }
  0x46   :  { %v910_v41 = vld [vmem:[#allocation7 + $0xa0] sm:$0xff]   ;;  %v913_v43 = vld [vmem:[#allocation7 + $0xa8] sm:$0xff]   ;;  %v916_v45 = vld [vmem:[#allocation7 + $0xb0] sm:$0xff]  }
  0x47   :  { %255 = vmatpush1.bf16.msra.mxu0 %v879_v12  ;;  %820 = vmatpush3.bf16.msra.mxu1 %v880_v13  ;;  %v915_v44 = vld [vmem:[#allocation7 + $0x28] sm:$0xff]   ;;  %v917_v46 = vld [vmem:[#allocation7 + $0x70] sm:$0xff]   ;;  %v919_v48 = vld [vmem:[#allocation7 + $0xb8] sm:$0xff]  }
  0x48   :  { %256 = vmatprep.subr.bf16.mxu0 %v881_v14  ;;  %821 = vmatprep.subr.bf16.mxu1 %v1051_v0  ;;  %v918_v47 = vld [vmem:[#allocation7 + $0x30] sm:$0xff]   ;;  %v920_v49 = vld [vmem:[#allocation7 + $0x78] sm:$0xff]  }
  0x49   :  { %v921_v50 = vld [vmem:[#allocation7 + $0x38] sm:$0xff]  }
  0x4a   :  { %v97_v54 = vld [vmem:[%s1186_s2] sm:$0x7]  ;;  %s1054_s2 = smov [#allocation8]  }
  0x4b   :  { %257 = vmatpush1.bf16.msra.mxu0 %v883_v15  ;;  %822 = vmatpush3.bf16.msra.mxu1 %v884_v16  ;;  %v102_v57 = vrot.slane %v97_v54, %v101_v53  ;;  %v110_v58 = vrot.slane %v97_v54, %v109_v55  ;;  %v106_v59 = vrot.slane %v97_v54, %v105_v56  ;;  %s678_s9 = sshll.u32 %s1054_s2, 4  ;;  %s679_s9 = int_to_ptr.vmem [resolvable:$true] %s678_s9 }
  0x4c   :  { %258 = vmatprep.subr.bf16.mxu0 %v885_v17  ;;  %823 = vmatprep.subr.bf16.mxu1 %v1051_v0  ;;  %s992_s10 = scalar_lea.vmem %s679_s9, 384  ;;  %p997_p11 = scmp.lt.s32.totalorder %s679_s9, %s679_s9 }
  0x4d   :  { %p993_p10 = scmp.ne.s32.totalorder %s679_s9, %s992_s10  ;;  %p998_p12 = scmp.lt.s32.totalorder %s992_s10, %s992_s10 }
  0x4f   :  { %259 = vmatpush1.bf16.msra.mxu0 %v887_v18  ;;  %824 = vmatpush3.bf16.msra.mxu1 %v888_v19  ;;  %p999_p13 = por %p998_p12, %p997_p11 }
  0x50   :  { %260 = vmatprep.subr.bf16.mxu0 %v889_v20  ;;  %825 = vmatprep.subr.bf16.mxu1 %v1051_v0 }
  0x51   :  { %p1000_p0 = pnand %p999_p13, %p993_p10 }
  0x53   :  { %261 = vmatpush1.bf16.msra.mxu0 %v891_v21  ;;  %826 = vmatpush3.bf16.msra.mxu1 %v892_v22 }
  0x54   :  { %262 = vmatprep.subr.bf16.mxu0 %v893_v23  ;;  %827 = vmatprep.subr.bf16.mxu1 %v1051_v0 }
  0x57   :  { %263 = vmatpush1.bf16.msra.mxu0 %v895_v24  ;;  %828 = vmatpush3.bf16.msra.mxu1 %v896_v25 }
  0x58   :  { %782 = vmatprep.subr.bf16.mxu0 %v899_v26  ;;  %833 = vmatprep.subr.bf16.mxu1 %v1051_v0 }
  0x5a   :  { %281 = vmatmul.mubr.bf16.vlgmr.msra.gmra.mrb[0].mxu0 %v897_v27  ;;  %830 = vmatmul.mubr.bf16.vlgmr.msra.gmra.mrb[0].mxu1 %v897_v27 }
  0x5b   :  { %783 = vmatpush3.bf16.msra.mxu0 %v900_v29  ;;  %834 = vmatpush3.bf16.msra.mxu1 %v898_v28 }
  0x5c   :  { %784 = vmatprep.subr.bf16.mxu0 %v902_v30  ;;  %835 = vmatprep.subr.bf16.mxu1 %v1051_v0 }
  0x5d   :  { %849 = vmatprep.mubr.msk.bf16.mxu1 %vm1053_vm0, %v1051_v0 }
  0x5f   :  { %785 = vmatpush3.bf16.msra.mxu0 %v903_v31  ;;  %836 = vmatpush3.bf16.msra.mxu1 %v901_v32 }
  0x60   :  { %786 = vmatprep.subr.bf16.mxu0 %v905_v33  ;;  %837 = vmatprep.subr.bf16.mxu1 %v1051_v0 }
  0x63   :  { %787 = vmatpush3.bf16.msra.mxu0 %v906_v34  ;;  %838 = vmatpush3.bf16.msra.mxu1 %v904_v35 }
  0x64   :  { %788 = vmatprep.subr.bf16.mxu0 %v908_v36  ;;  %839 = vmatprep.subr.bf16.mxu1 %v1051_v0 }
  0x67   :  { %789 = vmatpush3.bf16.msra.mxu0 %v909_v37  ;;  %840 = vmatpush3.bf16.msra.mxu1 %v907_v38 }
  0x68   :  { %790 = vmatprep.subr.bf16.mxu0 %v911_v39  ;;  %841 = vmatprep.subr.bf16.mxu1 %v1051_v0 }
  0x6b   :  { %791 = vmatpush3.bf16.msra.mxu0 %v912_v40  ;;  %842 = vmatpush3.bf16.msra.mxu1 %v910_v41 }
  0x6c   :  { %792 = vmatprep.subr.bf16.mxu0 %v914_v42  ;;  %843 = vmatprep.subr.bf16.mxu1 %v1051_v0 }
  0x6f   :  { %844 = vmatpush3.bf16.msra.mxu1 %v913_v43  ;;  %793 = vmatpush3.bf16.msra.mxu0 %v915_v44 }
  0x70   :  { %845 = vmatprep.subr.bf16.mxu1 %v1051_v0  ;;  %794 = vmatprep.subr.bf16.mxu0 %v917_v46 }
  0x73   :  { %846 = vmatpush3.bf16.msra.mxu1 %v916_v45  ;;  %795 = vmatpush3.bf16.msra.mxu0 %v918_v47 }
  0x74   :  { %847 = vmatprep.subr.bf16.mxu1 %v1051_v0  ;;  %796 = vmatprep.subr.bf16.mxu0 %v920_v49 }
  0x77   :  { %848 = vmatpush3.bf16.msra.mxu1 %v919_v48  ;;  %797 = vmatpush3.bf16.msra.mxu0 %v921_v50 }
 0x12d   :  { %v282_v60 = vpop.f32.mrb[0].mxu0  ;;  %v325_v62 = vpop.f32.mrb[0].mxu1 }
 0x12e   :  { %v283_v61 = vadd.f32 %v282_v60, %v102_v57  ;;  %v284_v63 = vpop.f32.mrb[1].mxu0  ;;  %v326_v0 = vadd.f32 %v325_v62, %v110_v58  ;;  %v831_v2 = vpop.f32.mrb[1].mxu1 }
 0x12f   :  { %v285_v1 = vadd.f32 %v284_v63, %v106_v59  ;;  %v286_v3 = vpop.f32.mrb[2].mxu0  ;;  %v328_v6 = vpop.f32.mrb[2].mxu1 }
 0x130   :  { %v332_v4 = vmax.f32 %v283_v61, 0.0  ;;  %v287_v5 = vadd.f32 %v286_v3, %v102_v57  ;;  %v288_v7 = vpop.f32.mrb[3].mxu0  ;;  %v334_v8 = vmax.f32 %v326_v0, 0.0  ;;  %v329_v10 = vadd.f32 %v328_v6, %v110_v58  ;;  %v832_v12 = vpop.f32.mrb[3].mxu1 }
 0x131   :  { %v333_v9 = vmax.f32 %v285_v1, 0.0  ;;  %v289_v11 = vadd.f32 %v288_v7, %v106_v59 }
 0x132   :  { %v335_v13 = vmax.f32 %v287_v5, 0.0  ;;  %v338_v14 = vmul.f32 %v332_v4, %v332_v4  ;;  %v337_v15 = vmax.f32 %v329_v10, 0.0  ;;  %v340_v18 = vmul.f32 %v334_v8, %v334_v8 }
 0x133   :  { %v336_v16 = vmax.f32 %v289_v11, 0.0  ;;  %v339_v17 = vmul.f32 %v333_v9, %v333_v9 }
 0x134   :  { %v341_v19 = vmul.f32 %v335_v13, %v335_v13  ;;  %v388_v20 = vpack.c.bf16 %v337_v15, %v334_v8  ;;  %v386_v24 = vpack.c.bf16 %v335_v13, %v332_v4  ;;  %v343_v26 = vmul.f32 %v337_v15, %v337_v15 }
 0x135   :  { %v387_v21 = vpack.c.bf16 %v336_v16, %v333_v9  ;;  %v344_v22 = vadd.f32 %v339_v17, %v338_v14  ;;  %v342_v23 = vmul.f32 %v336_v16, %v336_v16 }
 0x136   :  { %850 = vmatmul.mubr.bf16.vlgmr.msra.gmra.mrb[4].mxu1 %v388_v20 }
 0x137   :  { %613 = vmatprep.mubr.bf16.mxu0 %v387_v21  ;;  %v345_v25 = vadd.f32 %v344_v22, %v340_v18  ;;  %v348_v27 = vadd.f32 %v342_v23, %v341_v19 }
 0x138   :  { %614 = vmatmul.mubr.bf16.vlgmr.msra.gmra.mrb[4].mxu0 %v386_v24 }
 0x139   :  { %346 = vadd.xlane.f32.xlu0 %v345_v25  ;;  %v349_v28 = vadd.f32 %v348_v27, %v343_v26 }
 0x13d   :  { %350 = vadd.xlane.f32.xlu0 %v349_v28 }
 0x1c6   :  { %v347_v29 = vpop.xlane.xlu0 %346 }
 0x1c7   :  { %v352_v30 = vadd.f32 1e-12, %v347_v29 }
 0x1c9   :  { %922 = vrsqrt.f32 %v352_v30 }
 0x1ca   :  { %v351_v31 = vpop.xlane.xlu0 %350 }
 0x1cb   :  { %v353_v32 = vadd.f32 1e-12, %v351_v31 }
 0x1cd   :  { %924 = vrsqrt.f32 %v353_v32 }
 0x1d3   :  { %v923_v33 = vpop.eup %922 }
 0x1d4   :  { %v356_v34 = vmul.f32 %v923_v33, %v332_v4  ;;  %v357_v35 = vmul.f32 %v923_v33, %v333_v9  ;;  %v358_v36 = vmul.f32 %v923_v33, %v334_v8 }
 0x1d6   :  { %v762_v37 = vpack.c.bf16 %v357_v35, %v356_v34  ;;  %v763_v38 = vpack.c.bf16 %v358_v36, %v358_v36 }
 0x1d7   :  { %v925_v39 = vpop.eup %924 }
 0x1d8   :  { %v359_v40 = vmul.f32 %v925_v39, %v335_v13  ;;  %v360_v41 = vmul.f32 %v925_v39, %v336_v16  ;;  %v361_v42 = vmul.f32 %v925_v39, %v337_v15  ;;  %382 = vst [vmem:[#allocation8] sm:$0xff] %v762_v37  ;;  %383 = vst [vmem:[#allocation8 + $0x8] sm:$0xf] %v763_v38 }
 0x1da   :  { %v764_v43 = vpack.c.bf16 %v360_v41, %v359_v40  ;;  %v765_v44 = vpack.c.bf16 %v361_v42, %v361_v42 }
 0x1dc   :  { %384 = vst [vmem:[#allocation8 + $0xc] sm:$0xff] %v764_v43  ;;  %385 = vst [vmem:[#allocation8 + $0x14] sm:$0xf] %v765_v44 }
 0x1dd   :  { %1003 = shalt.err (!%p1000_p0)
}
 0x1de   :  { %s1004_s13 = scalar_lea.hbm %s1188_s4, 384 }
 0x1df   :  { %p1005_p1 = scmp.ne.s32.totalorder %s1188_s4, %s1004_s13  ;;  %p1008_p2 = scmp.lt.u32.totalorder %s1004_s13, %s1188_s4 }
 0x1e1   :  { %p1010_p3 = pnand %p1008_p2, %p1005_p1 }
 0x1e3   :  { %1013 = shalt.err (!%p1010_p3)
}
 0x1e4   :  { %684 = dma.vmem_to_hbm [thread:$0]  %s679_s9, 384, %s1188_s4, [#allocation4], %s1045_s28, %s1045_s28, %s1046_s29  }
 0x1e5   :  { %s1055_s21 = smov [#allocation9]  }
 0x1e6   :  { %s690_s22 = sshll.u32 %s1055_s21, 4  ;;  %s691_s22 = int_to_ptr.vmem [resolvable:$true] %s690_s22 }
 0x1e7   :  { %s1014_s23 = scalar_lea.vmem %s691_s22, 128  ;;  %p1019_p5 = scmp.lt.s32.totalorder %s691_s22, %s691_s22 }
 0x1e8   :  { %p1015_p4 = scmp.ne.s32.totalorder %s691_s22, %s1014_s23  ;;  %p1020_p6 = scmp.lt.s32.totalorder %s1014_s23, %s1014_s23 }
 0x1ea   :  { %p1021_p7 = por %p1020_p6, %p1019_p5 }
 0x1ec   :  { %p1022_p8 = pnand %p1021_p7, %p1015_p4 }
 0x209   :  { %v656_v45 = vpop.f32.mrb[4].mxu1 }
 0x20a   :  { %v851_v46 = vpop.f32.mrb[5].mxu1 }
 0x20b   :  { %v798_v47 = vpop.f32.mrb[4].mxu0  ;;  %v659_v48 = vpop.f32.mrb[6].mxu1 }
 0x20c   :  { %v799_v49 = vpop.f32.mrb[5].mxu0  ;;  %v852_v51 = vpop.f32.mrb[7].mxu1 }
 0x20d   :  { %v800_v50 = vadd.f32 %v799_v49, %v798_v47  ;;  %v801_v52 = vpop.f32.mrb[6].mxu0 }
 0x20e   :  { %v802_v53 = vpop.f32.mrb[7].mxu0 }
 0x20f   :  { %v657_v54 = vadd.f32 %v800_v50, %v656_v45  ;;  %v803_v55 = vadd.f32 %v802_v53, %v801_v52 }
 0x211   :  { %v660_v56 = vadd.f32 %v803_v55, %v659_v48 }
 0x213   :  { %v771_v57 = vpack.c.bf16 %v660_v56, %v657_v54 }
 0x215   :  { %772 = vst [vmem:[#allocation9] sm:$0xff] %v771_v57  }
 0x216   :  { %1025 = shalt.err (!%p1022_p8)
}
 0x217   :  { %s1026_s29 = scalar_lea.hbm %s1189_s5, 128 }
 0x218   :  { %p1027_p9 = scmp.ne.s32.totalorder %s1189_s5, %s1026_s29  ;;  %p1030_p10 = scmp.lt.u32.totalorder %s1026_s29, %s1189_s5 }
 0x21a   :  { %p1032_p11 = pnand %p1030_p10, %p1027_p9 }
 0x21c   :  { %1035 = shalt.err (!%p1032_p11)
}
 0x21d   :  { %696 = dma.vmem_to_hbm [thread:$0]  %s691_s22, 128, %s1189_s5, [#allocation10], %s1048_s1, %s1048_s1, %s1049_s17  }
 0x21e   :  { %1040 = dma.done.wait [#allocation4], 384  }
 0x21f   :  { %1041 = vsyncadd [#allocation4], 4294966912 }
 0x220   :  { %1042 = dma.done.wait [#allocation10], 128  }
 0x221   :  { %1043 = vsyncadd [#allocation10], 4294967168 }
 0x222   :  { %703 = vsyncpa [#allocation3], 1 }
 0x223   :  { %704 = vsyncpa [#allocation6], 1 }
 0x224   :  { %705 = vsyncpa [#allocation4], 1 }
 0x225   :  { %706 = vsyncpa [#allocation10], 1 }

</bundles_post_ra>
